<compile_context>
chip_gen: v6e
topology: v6e:2x2x1
jax: 0.10.0
libtpu: 0.0.40
codegen_flags: <defaults>
</compile_context>

<pallas_src>
import functools
import math

import jax
import jax.numpy as jnp
import numpy as np
from jax.experimental import pallas as pl
from jax.experimental.pallas import tpu as pltpu

_LANE_WIDTHS = (1024, 512, 256, 128)   # lane-dense slab widths (multiples of 128)
_TARGET_BLOCK_ELEMS = 512 * 1024       # ~2 MiB f32 per tile
_FAST_PATH_MAX_ELEMS = 512 * 1024      # <= 2 MiB f32 -> single fused pallas_call


def _round_up(a, b):
    return (a + b - 1) // b * b


def _pick_lane_width(n):
    for w in _LANE_WIDTHS:
        if n % w == 0:
            return w
    return None


def _quant_params(x_min, x_max, n_bits):
    """SymmetricUniformQuantizer params from (1,1)-shaped min/max (vector ops only)."""
    imax_signed = float(2 ** (n_bits - 1) - 1)
    imax_unsigned = float(2 ** n_bits - 1)
    imin_signed = float(-(2 ** (n_bits - 1)))
    signed = x_min < 0.0
    int_max = jnp.where(signed, imax_signed, imax_unsigned)
    int_min = jnp.where(signed, imin_signed, 0.0)
    absmax = jnp.maximum(jnp.abs(x_min), x_max)
    # Tiny clamp guards an all-zero tensor (delta == 0 -> NaN). Intentional
    # deviation from strict PyTorch, which would divide by zero.
    delta = jnp.maximum(absmax / int_max, jnp.float32(1e-12))
    inv_delta = 1.0 / delta
    return (delta.astype(jnp.float32), inv_delta.astype(jnp.float32),
            int_min.astype(jnp.float32), int_max.astype(jnp.float32))


# ---------------------------------------------------------------------------
# Fast path: whole tensor resident in VMEM, one grid step.
# ---------------------------------------------------------------------------
def _fused_qdq_kernel(x_ref, o_ref, *, n_bits):
    x = x_ref[...].astype(jnp.float32)
    x_min = jnp.min(x, keepdims=True)          # (1, 1)
    x_max = jnp.max(x, keepdims=True)          # (1, 1)
    delta, inv_delta, int_min, int_max = _quant_params(x_min, x_max, n_bits)
    x_int = jnp.clip(jnp.round(x * inv_delta), int_min, int_max)
    o_ref[...] = (x_int * delta).astype(o_ref.dtype)


# ---------------------------------------------------------------------------
# Large path, pass 1: min/max reduction + quantizer params.
# ---------------------------------------------------------------------------
def _minmax_params_kernel(x_ref, delta_ref, inv_ref, qmin_ref, qmax_ref,
                          vmin_ref, vmax_ref, *, n_bits, valid_rows, needs_mask):
    i = pl.program_id(0)

    @pl.when(i == 0)
    def _init():
        vmin_ref[...] = jnp.full(vmin_ref.shape, jnp.inf, jnp.float32)
        vmax_ref[...] = jnp.full(vmax_ref.shape, -jnp.inf, jnp.float32)

    x = x_ref[...].astype(jnp.float32)          # (block_rows, w)
    r, w = x.shape
    if needs_mask:
        # The last tile can run past the (rows, w) array; mask OOB rows so the
        # garbage the partial-block DMA leaves in VMEM never reaches min/max.
        rid = jax.lax.broadcasted_iota(jnp.int32, (r, w), 0) + i * r
        valid = rid < valid_rows
        x_lo = jnp.where(valid, x, jnp.inf)
        x_hi = jnp.where(valid, x, -jnp.inf)
    else:
        x_lo = x_hi = x

    # Deferred reduction: per-tile work stays elementwise on the VPU; the
    # cross-sublane/lane reduction runs exactly once, in the finalize step.
    vmin_ref[...] = jnp.minimum(vmin_ref[...],
                                jnp.min(x_lo.reshape(r // 8, 8, w), axis=0))
    vmax_ref[...] = jnp.maximum(vmax_ref[...],
                                jnp.max(x_hi.reshape(r // 8, 8, w), axis=0))

    @pl.when(i == pl.num_programs(0) - 1)
    def _finalize():
        x_min = jnp.min(vmin_ref[...], keepdims=True)
        x_max = jnp.max(vmax_ref[...], keepdims=True)
        delta, inv_delta, int_min, int_max = _quant_params(x_min, x_max, n_bits)
        delta_ref[...] = delta
        inv_ref[...] = inv_delta
        qmin_ref[...] = int_min
        qmax_ref[...] = int_max


# ---------------------------------------------------------------------------
# Large path, pass 2: pure elementwise quantize-dequantize.
# ---------------------------------------------------------------------------
def _qdq_kernel(delta_ref, inv_ref, qmin_ref, qmax_ref, x_ref, o_ref):
    delta = delta_ref[0, 0]        # SMEM scalars
    inv_delta = inv_ref[0, 0]
    qmin = qmin_ref[0, 0]
    qmax = qmax_ref[0, 0]
    x = x_ref[...].astype(jnp.float32)
    x_int = jnp.clip(jnp.round(x * inv_delta), qmin, qmax)
    o_ref[...] = (x_int * delta).astype(o_ref.dtype)


@functools.partial(jax.jit, static_argnames=("n_bits",))
def quantization_manager_forward(x, n_bits=8):
    """Pallas implementation of QuantizationManager.forward
    (per-tensor symmetric fake-quant with CurrentMinMax range estimation)."""
    assert 2 <= n_bits <= 24, "int grid is carried as f32; exact only for n_bits <= 24"
    orig_shape = x.shape
    orig_dtype = x.dtype
    n = math.prod(orig_shape)
    if n == 0:
        return x

    flat = x.reshape(-1)           # reshape of contiguous data: no copy

    # ---- Fast path: single fused call, whole tensor as one VMEM block ------
    if n <= _FAST_PATH_MAX_ELEMS:
        w = _pick_lane_width(n)
        rows = n // w if w is not None else 1
        w = w if w is not None else n
        x2d = flat.reshape(rows, w)
        out2d = pl.pallas_call(
            functools.partial(_fused_qdq_kernel, n_bits=n_bits),
            out_shape=jax.ShapeDtypeStruct((rows, w), orig_dtype),
            grid_spec=pltpu.PrefetchScalarGridSpec(
                num_scalar_prefetch=0,
                grid=(1,),
                in_specs=[pl.BlockSpec((rows, w), lambda i: (0, 0))],
                out_specs=pl.BlockSpec((rows, w), lambda i: (0, 0)),
            ),
            compiler_params=pltpu.CompilerParams(
                dimension_semantics=("arbitrary",)),
        )(x2d)
        return out2d.reshape(orig_shape)

    # ---- Large path: two passes over HBM ------------------------------------
    w = _pick_lane_width(n)
    if w is None:
        # Rare fallback (large tensor, element count not a multiple of 128):
        # pad the tail with an interior value (first element; cannot change the
        # global min/max) and trim after the QDQ pass.
        w = _LANE_WIDTHS[0]
        rows = -(-n // w)
        flat = jnp.concatenate(
            [flat, jnp.broadcast_to(flat[0], (rows * w - n,)).astype(flat.dtype)])
        trim = True
    else:
        rows = n // w              # exact: no padding copy, no trailing slice
        trim = False

    x2d = flat.reshape(rows, w)
    block_rows = min(_round_up(rows, 8), _round_up(_TARGET_BLOCK_ELEMS // w, 8))
    n_tiles = -(-rows // block_rows)
    needs_mask = (rows % block_rows) != 0

    # Pass 1: global range estimation (CurrentMinMax) + quantizer params,
    # all computed inside the kernel's finalize step.
    delta, inv_delta, qmin, qmax = pl.pallas_call(
        functools.partial(_minmax_params_kernel, n_bits=n_bits,
                          valid_rows=rows, needs_mask=needs_mask),
        out_shape=tuple(jax.ShapeDtypeStruct((1, 1), jnp.float32)
                        for _ in range(4)),
        grid_spec=pltpu.PrefetchScalarGridSpec(
            num_scalar_prefetch=0,
            grid=(n_tiles,),
            in_specs=[pl.BlockSpec((block_rows, w), lambda i: (i, 0))],
            out_specs=[pl.BlockSpec((1, 1), lambda i: (0, 0))
                       for _ in range(4)],
            scratch_shapes=[pltpu.VMEM((8, w), jnp.float32),
                            pltpu.VMEM((8, w), jnp.float32)],
        ),
        compiler_params=pltpu.CompilerParams(
            dimension_semantics=("arbitrary",)),
    )(x2d)
    # TODO(synk): on v7x, pass 1 could additionally be sharded across both
    # TensorCores (grid=(2, tiles//2) with per-core partial min/max); skipped to
    # keep the params-in-kernel epilogue and avoid ragged per-core output blocks.

    # Pass 2: elementwise QDQ; params are SMEM scalars; fully "parallel" grid
    # (2-TC sharding on v7x). A partial last block is fine: OOB reads are
    # garbage that only feeds dropped OOB writes.
    out2d = pl.pallas_call(
        _qdq_kernel,
        out_shape=jax.ShapeDtypeStruct((rows, w), orig_dtype),
        grid_spec=pltpu.PrefetchScalarGridSpec(
            num_scalar_prefetch=0,
            grid=(n_tiles,),
            in_specs=[pl.BlockSpec(memory_space=pltpu.MemorySpace.SMEM)
                      for _ in range(4)]
                     + [pl.BlockSpec((block_rows, w), lambda i: (i, 0))],
            out_specs=pl.BlockSpec((block_rows, w), lambda i: (i, 0)),
        ),
        compiler_params=pltpu.CompilerParams(
            dimension_semantics=("parallel",)),
    )(delta, inv_delta, qmin, qmax, x2d)

    if trim:
        return out2d.reshape(-1)[:n].reshape(orig_shape)
    return out2d.reshape(orig_shape)


def _reference(x, n_bits=8):
    """Plain-JAX reference mirroring SymmetricUniformQuantizer + CurrentMinMax."""
    xf = x.astype(jnp.float32)
    x_min, x_max = jnp.min(xf), jnp.max(xf)
    signed = x_min < 0.0
    int_max = jnp.where(signed, 2.0 ** (n_bits - 1) - 1.0, 2.0 ** n_bits - 1.0)
    int_min = jnp.where(signed, -(2.0 ** (n_bits - 1)), 0.0)
    delta = jnp.maximum(jnp.maximum(jnp.abs(x_min), x_max) / int_max,
                        jnp.float32(1e-12))
    x_int = jnp.clip(jnp.round(xf * (1.0 / delta)), int_min, int_max)
    return (x_int * delta).astype(x.dtype)


def _check(x, n_bits=8):
    out = jax.block_until_ready(quantization_manager_forward(x, n_bits=n_bits))
    assert out.shape == x.shape and out.dtype == x.dtype
    ref = np.asarray(_reference(x, n_bits))
    out_np = np.asarray(out)

    xf = np.asarray(x, dtype=np.float32)
    int_max = (2.0 ** (n_bits - 1) - 1.0) if xf.min() < 0 else (2.0 ** n_bits - 1.0)
    delta = max(max(abs(float(xf.min())), float(xf.max())) / int_max, 1e-12)

    diff = np.abs(out_np.astype(np.float32) - ref.astype(np.float32))
    # Results are expected bit-identical; tolerate at most one quantization step
    # on exact-.5 rounding ties (the in-kernel f32 divide may differ by 1 ulp
    # from the XLA reference), and require near-exactness almost everywhere.
    assert np.all(diff <= delta * 1.0001 + 1e-7), float(diff.max())
    assert np.mean(diff > 1e-6) <= 0.01, float(np.mean(diff > 1e-6))


# TODO(synk): only the default path (estimate_ranges + per-tensor symmetric
# quantizer) is implemented; fix_ranges / learn_ranges state machine,
# per-channel and block-wise quantization variants are not translated.

if __name__ == "__main__":
    key = jax.random.PRNGKey(0)
    k1, k2, k3 = jax.random.split(key, 3)

    # NCHW activation (fast fused path, signed grid).
    x = jax.random.normal(k1, (2, 4, 16, 16), dtype=jnp.float32)
    _check(x)

    # Odd, all-positive shape (fast path, (1, n) single block, unsigned grid).
    x2 = 3.0 + jax.random.uniform(k2, (2, 3, 5, 7), dtype=jnp.float32)
    _check(x2)

    # Larger activation: exercises the tiled two-pass path, including the masked
    # partial last tile (n = 532480 > fast-path limit; rows = 520, block = 512).
    x3 = jax.random.normal(k3, (2, 4, 256, 260), dtype=jnp.float32)
    _check(x3)

    print("KERNEL_OK")
</pallas_src>

<mosaic_0001>
module attributes {stable_mosaic.version = 11 : i64} {
  func.func @_fused_qdq_kernel(%arg0: i32, %arg1: memref<2x1024xf32, #tpu.memory_space<vmem>>, %arg2: memref<2x1024xf32, #tpu.memory_space<vmem>>) attributes {dimension_semantics = [#tpu.dimension_semantics<arbitrary>], iteration_bounds = array<i64: 1>, scalar_prefetch = 0 : i64, scratch_operands = 0 : i64, tpu.core_type = #tpu.core_type<tc>, window_params = [{pipeline_mode = #tpu.pipeline_mode<synchronous>, transform_indices = @transform_0, window_bounds = array<i64: 2, 1024>}, {pipeline_mode = #tpu.pipeline_mode<synchronous>, transform_indices = @transform_1, window_bounds = array<i64: 2, 1024>}]} {
    %c0 = arith.constant 0 : index
    %c0_0 = arith.constant 0 : index
    %0 = vector.load %arg1[%c0, %c0_0] : memref<2x1024xf32, #tpu.memory_space<vmem>>, vector<2x1024xf32>
    %1 = vector.shape_cast %0 : vector<2x1024xf32> to vector<1x2x1024xf32>
    %cst = arith.constant dense<0x7F800000> : vector<1xf32>
    %2 = vector.multi_reduction <minimumf>, %1, %cst [1, 2] : vector<1x2x1024xf32> to vector<1xf32>
    %3 = vector.shape_cast %2 : vector<1xf32> to vector<1x1x1xf32>
    %4 = vector.extract %3[0, 0, 0] : f32 from vector<1x1x1xf32>
    %5 = vector.broadcast %4 : f32 to vector<1x1xf32>
    %6 = vector.shape_cast %0 : vector<2x1024xf32> to vector<1x2x1024xf32>
    %cst_1 = arith.constant dense<0xFF800000> : vector<1xf32>
    %7 = vector.multi_reduction <maximumf>, %6, %cst_1 [1, 2] : vector<1x2x1024xf32> to vector<1xf32>
    %8 = vector.shape_cast %7 : vector<1xf32> to vector<1x1x1xf32>
    %9 = vector.extract %8[0, 0, 0] : f32 from vector<1x1x1xf32>
    %10 = vector.broadcast %9 : f32 to vector<1x1xf32>
    %cst_2 = arith.constant 0.000000e+00 : f32
    %11 = vector.broadcast %cst_2 : f32 to vector<1x1xf32>
    %12 = arith.cmpf olt, %5, %11 : vector<1x1xf32>
    %cst_3 = arith.constant 1.270000e+02 : f32
    %cst_4 = arith.constant 2.550000e+02 : f32
    %13 = vector.broadcast %cst_3 : f32 to vector<1x1xf32>
    %14 = vector.broadcast %cst_4 : f32 to vector<1x1xf32>
    %15 = arith.select %12, %13, %14 : vector<1x1xi1>, vector<1x1xf32>
    %cst_5 = arith.constant -1.280000e+02 : f32
    %cst_6 = arith.constant 0.000000e+00 : f32
    %16 = vector.broadcast %cst_5 : f32 to vector<1x1xf32>
    %17 = vector.broadcast %cst_6 : f32 to vector<1x1xf32>
    %18 = arith.select %12, %16, %17 : vector<1x1xi1>, vector<1x1xf32>
    %19 = math.absf %5 : vector<1x1xf32>
    %20 = arith.maximumf %19, %10 : vector<1x1xf32>
    %21 = arith.divf %20, %15 : vector<1x1xf32>
    %cst_7 = arith.constant 9.99999996E-13 : f32
    %22 = vector.broadcast %cst_7 : f32 to vector<1x1xf32>
    %23 = arith.maximumf %21, %22 : vector<1x1xf32>
    %cst_8 = arith.constant 1.000000e+00 : f32
    %24 = vector.broadcast %cst_8 : f32 to vector<1x1xf32>
    %25 = arith.divf %24, %23 : vector<1x1xf32>
    %26 = vector.broadcast %25 : vector<1x1xf32> to vector<2x1024xf32>
    %27 = arith.mulf %0, %26 : vector<2x1024xf32>
    %28 = math.roundeven %27 : vector<2x1024xf32>
    %29 = vector.broadcast %18 : vector<1x1xf32> to vector<2x1024xf32>
    %30 = arith.maximumf %29, %28 : vector<2x1024xf32>
    %31 = vector.broadcast %15 : vector<1x1xf32> to vector<2x1024xf32>
    %32 = arith.minimumf %31, %30 : vector<2x1024xf32>
    %33 = vector.broadcast %23 : vector<1x1xf32> to vector<2x1024xf32>
    %34 = arith.mulf %32, %33 : vector<2x1024xf32>
    %c0_9 = arith.constant 0 : index
    %c0_10 = arith.constant 0 : index
    %35 = vector.load %arg2[%c0_9, %c0_10] : memref<2x1024xf32, #tpu.memory_space<vmem>>, vector<2x1024xf32>
    tpu.vector_store %arg2[%c0_9, %c0_10], %34 {strides = array<i32>} : memref<2x1024xf32, #tpu.memory_space<vmem>>, vector<2x1024xf32>,
    return
  }
  func.func @transform_0(%arg0: i32) -> (i32, i32) {
    %c0_i32 = arith.constant 0 : i32
    %c0_i32_0 = arith.constant 0 : i32
    %c0_i32_1 = arith.constant 0 : i32
    return %c0_i32, %c0_i32_0 : i32, i32
  }
  func.func @transform_1(%arg0: i32) -> (i32, i32) {
    %c0_i32 = arith.constant 0 : i32
    %c0_i32_0 = arith.constant 0 : i32
    %c0_i32_1 = arith.constant 0 : i32
    return %c0_i32, %c0_i32_0 : i32, i32
  }
}

</mosaic_0001>

<bundles_post_ra>
// kernel: quantization_manager_forward.1
= control target key start
LH: loop header
LB: loop body
LE: loop exit
PB: predicated region body
PF: predicated region fallthrough
CT: control target
= control target key end

     0   :  { %v16_v0 = vlaneseq  ;;  %v160_v3 = vmov 1983009808   ;;  %vm54_vm0 = vcmask 1041408   ;;  %s221_s0 = inlined_call_operand.vmem [shape: f32[2,1024], index: 0, kind: input, shape index: {}]   ;;  %s222_s1 = inlined_call_operand.vmem [shape: f32[2,1024], index: 1, kind: output, shape index: {}]  }
   0x1   :  { %v176_v1 = vld [vmem:[%s221_s0] sm:$0xff]  ;;  %v181_v2 = vld [vmem:[%s221_s0 + $0x8] sm:$0xff]  ;;  %v14_v4 = vunpack.c.l.s4 %v160_v3 }
   0x2   :  { %v17_v5 = vshrl.u32 %v16_v0, 7  ;;  %v12_v6 = vcombine.high %v176_v1, %v176_v1  ;;  %v29_v8 = vcombine.high %v181_v2, %v181_v2  ;;  %v161_v0 = vmov 255.0  }
   0x3   :  { %v15_v7 = vunpack.c.0.s8 %v14_v4 }
   0x5   :  { %v18_v9 = vsub.s32 %v15_v7, %v17_v5 }
   0x7   :  { %v19_v10 = vrot.slane %v176_v1, %v18_v9  ;;  %v26_v11 = vrot.slane %v12_v6, %v18_v9  ;;  %v36_v12 = vrot.slane %v181_v2, %v18_v9  ;;  %v43_v13 = vrot.slane %v29_v8, %v18_v9 }
   0x9   :  { %v27_v14 = vcombine.high %v19_v10, %v19_v10  ;;  %v28_v15 = vcombine.high %v26_v11, %v26_v11  ;;  %v44_v16 = vcombine.high %v36_v12, %v36_v12  ;;  %v45_v17 = vcombine.high %v43_v13, %v43_v13 }
   0xa   :  { %v55_v18 = vsel %vm54_vm0, %v19_v10, inf  ;;  %v57_v19 = vsel %vm54_vm0, %v26_v11, inf  ;;  %v59_v20 = vsel %vm54_vm0, %v36_v12, inf  ;;  %v63_v21 = vsel %vm54_vm0, %v43_v13, inf }
   0xb   :  { %v56_v22 = vsel %vm54_vm0, %v27_v14, inf  ;;  %v58_v23 = vsel %vm54_vm0, %v28_v15, inf  ;;  %v60_v24 = vmin.f32 %v55_v18, %v59_v20  ;;  %v61_v25 = vsel %vm54_vm0, %v44_v16, inf }
   0xc   :  { %v62_v26 = vmin.f32 %v56_v22, %v61_v25  ;;  %v64_v27 = vmin.f32 %v57_v19, %v63_v21  ;;  %v65_v28 = vsel %vm54_vm0, %v45_v17, inf  ;;  %v80_v29 = vsel %vm54_vm0, %v19_v10, -inf }
   0xd   :  { %v66_v30 = vmin.f32 %v58_v23, %v65_v28  ;;  %v81_v31 = vsel %vm54_vm0, %v27_v14, -inf  ;;  %v82_v32 = vsel %vm54_vm0, %v26_v11, -inf  ;;  %v83_v33 = vsel %vm54_vm0, %v28_v15, -inf }
   0xe   :  { %v67_v34 = vmin.f32 %v60_v24, %v62_v26  ;;  %v84_v35 = vsel %vm54_vm0, %v36_v12, -inf  ;;  %v86_v36 = vsel %vm54_vm0, %v44_v16, -inf  ;;  %v88_v37 = vsel %vm54_vm0, %v43_v13, -inf }
   0xf   :  { %v68_v38 = vmin.f32 %v64_v27, %v66_v30  ;;  %v85_v39 = vmax.f32 %v80_v29, %v84_v35  ;;  %v87_v40 = vmax.f32 %v81_v31, %v86_v36  ;;  %v89_v41 = vmax.f32 %v82_v32, %v88_v37 }
  0x10   :  { %v90_v42 = vsel %vm54_vm0, %v45_v17, -inf  ;;  %v162_v25 = vmov 0.0  }
  0x11   :  { %v69_v43 = vmin.f32 %v67_v34, %v68_v38  ;;  %v91_v44 = vmax.f32 %v83_v33, %v90_v42  ;;  %v92_v45 = vmax.f32 %v85_v39, %v87_v40 }
  0x13   :  { %70 = vmin.xlane.f32.xlu0 %v69_v43  ;;  %v93_v46 = vmax.f32 %v89_v41, %v91_v44 }
  0x15   :  { %v94_v47 = vmax.f32 %v92_v45, %v93_v46 }
  0x17   :  { %95 = vmax.xlane.f32.xlu0 %v94_v47 }
  0x9c   :  { %v71_v48 = vpop.xlane.xlu0 %70 }
  0x9d   :  { %v72_v49 = vrot.slane %v71_v48, 4 }
  0x9f   :  { %v73_v50 = vmin.f32 %v71_v48, %v72_v49 }
  0xa0   :  { %v96_v51 = vpop.xlane.xlu0 %95 }
  0xa1   :  { %v74_v52 = vrot.slane %v73_v50, 2  ;;  %v97_v53 = vrot.slane %v96_v51, 4 }
  0xa3   :  { %v98_v54 = vmax.f32 %v96_v51, %v97_v53  ;;  %v75_v55 = vmin.f32 %v73_v50, %v74_v52 }
  0xa5   :  { %v99_v56 = vrot.slane %v98_v54, 2  ;;  %v76_v57 = vrot.slane %v75_v55, 1 }
  0xa7   :  { %v100_v58 = vmax.f32 %v98_v54, %v99_v56  ;;  %v77_v59 = vmin.f32 %v75_v55, %v76_v57 }
  0xa9   :  { %131 = vpush %v77_v59  ;;  %v101_v60 = vrot.slane %v100_v58, 1 }
  0xab   :  { %v102_v61 = vmax.f32 %v100_v58, %v101_v60 }
  0xad   :  { %133 = vpush %v102_v61 }
  0xda   :  { %s132_s0 = spop %131 }
  0xdb   :  { %v79_v62 = vstv %s132_s0 }
  0xdc   :  { %vm205_vm1 = vcmp.lt.f32.partialorder %v79_v62, 0.0  ;;  %v108_v5 = vand.u32 2147483647, %v79_v62 }
  0xdd   :  { %v106_v3 = vsel %vm205_vm1, 127.0, %v161_v0  ;;  %v107_v26 = vsel %vm205_vm1, -128.0, %v162_v25 }
  0xde   :  { %156 = vrcp.f32 %v106_v3  ;;  %s134_s10 = spop %133 }
  0xdf   :  { %v104_v4 = vstv %s134_s10 }
  0xe0   :  { %v109_v6 = vmax.f32 %v108_v5, %v104_v4 }
  0xeb   :  { %v157_v7 = vpop.eup %156 }
  0xec   :  { %v111_v8 = vmul.f32 %v157_v7, %v109_v6 }
  0xee   :  { %v112_v9 = vmax.f32 %v111_v8, 1e-12 }
  0xf0   :  { %158 = vrcp.f32 %v112_v9 }
  0xfd   :  { %v159_v10 = vpop.eup %158 }
  0xfe   :  { %v115_v11 = vmul.f32 %v159_v10, %v176_v1  ;;  %v116_v12 = vmul.f32 %v159_v10, %v181_v2 }
 0x100   :  { %v137_v13 = vcvt.f32.s32 %v115_v11  ;;  %v145_v14 = vcvt.f32.s32 %v116_v12  ;;  %v135_v16 = vand.u32 2147483647, %v115_v11  ;;  %v140_v19 = vand.u32 2147483648, %v115_v11 }
 0x101   :  { %v143_v20 = vand.u32 2147483647, %v116_v12  ;;  %v148_v22 = vand.u32 2147483648, %v116_v12 }
 0x102   :  { %v138_v15 = vcvt.s32.f32 %v137_v13  ;;  %v146_v17 = vcvt.s32.f32 %v145_v14  ;;  %vm136_vm2 = vcmp.lt.f32.partialorder %v135_v16, 8388608.0 }
 0x103   :  { %vm144_vm3 = vcmp.lt.f32.partialorder %v143_v20, 8388608.0 }
 0x104   :  { %v139_v18 = vand.u32 2147483647, %v138_v15  ;;  %v147_v21 = vand.u32 2147483647, %v146_v17 }
 0x106   :  { %v141_v23 = vor.u32 %v140_v19, %v139_v18  ;;  %v149_v24 = vor.u32 %v148_v22, %v147_v21 }
 0x108   :  { %v142_v1 = vsel %vm136_vm2, %v141_v23, %v115_v11  ;;  %v150_v2 = vsel %vm144_vm3, %v149_v24, %v116_v12 }
 0x109   :  { %v119_v27 = vmax.f32 %v107_v26, %v142_v1  ;;  %v120_v28 = vmax.f32 %v107_v26, %v150_v2 }
 0x10b   :  { %v121_v29 = vmin.f32 %v106_v3, %v119_v27  ;;  %v122_v30 = vmin.f32 %v106_v3, %v120_v28 }
 0x10d   :  { %v123_v31 = vmul.f32 %v121_v29, %v112_v9  ;;  %v124_v32 = vmul.f32 %v122_v30, %v112_v9 }
 0x10f   :  { %125 = vst [vmem:[%s222_s1] sm:$0xff] %v123_v31  ;;  %126 = vst [vmem:[%s222_s1 + $0x8] sm:$0xff] %v124_v32 }

</bundles_post_ra>
